<compile_context>
chip_gen: v6e
topology: v6e:2x2x1
jax: 0.10.0
libtpu: 0.0.40
codegen_flags: <defaults>
</compile_context>

<pallas_src>
import jax
import jax.numpy as jnp
from jax.experimental import pallas as pl
from jax.experimental.pallas import tpu as pltpu


def _fused_forward_kernel(temp_ref, tok_ids_ref, seg_ids_ref, feat_ref,
                          tok_tab_ref, seg_tab_ref, w_ref, b_ref,
                          o_ref, pooled_ref):
    """Embedding gather + mean-pool + linear head + temperature scale, fused.

    temp_ref   : (1, 1)   f32  SMEM  learned temperature
    tok_ids_ref: (B, S)   i32  VMEM  token ids
    seg_ids_ref: (B, S)   i32  VMEM  segment ids
    feat_ref   : (B, F)   f32  VMEM  dense features
    tok_tab_ref: (V, Dt)  f32  VMEM  token embedding table
    seg_tab_ref: (Ns, Ds) f32  VMEM  segment embedding table
    w_ref      : (H, C)   f32  VMEM  classifier weight, H = Dt + Ds + F
    b_ref      : (1, C)   f32  VMEM  classifier bias
    o_ref      : (B, C)   f32  VMEM  temperature-scaled logits
    pooled_ref : (B, H)   f32  VMEM scratch: assembled pooled activations
    """
    B, S = tok_ids_ref.shape
    V, Dt = tok_tab_ref.shape
    Ns, Ds = seg_tab_ref.shape
    F = feat_ref.shape[1]
    inv_s = 1.0 / S

    # Embedding gather + mean-pool expressed as a one-hot-count matmul:
    #   mean_s E[ids[b, s]] == (counts[b, :] @ E) / S,
    #   counts[b, v] = #{s : ids[b, s] == v}.
    tok_ids = tok_ids_ref[...]                                         # (B, S)
    tok_onehot = (tok_ids[:, :, None] ==
                  jax.lax.broadcasted_iota(jnp.int32, (B, S, V), 2))
    tok_counts = jnp.sum(tok_onehot.astype(jnp.float32), axis=1)       # (B, V)
    tok_pooled = jnp.dot(tok_counts, tok_tab_ref[...],
                         preferred_element_type=jnp.float32) * inv_s   # (B, Dt)

    seg_ids = seg_ids_ref[...]
    seg_onehot = (seg_ids[:, :, None] ==
                  jax.lax.broadcasted_iota(jnp.int32, (B, S, Ns), 2))
    seg_counts = jnp.sum(seg_onehot.astype(jnp.float32), axis=1)       # (B, Ns)
    seg_pooled = jnp.dot(seg_counts, seg_tab_ref[...],
                         preferred_element_type=jnp.float32) * inv_s   # (B, Ds)

    # Assemble the (B, H=128) pooled activation with static lane-slice stores,
    # then run ONE lane-aligned K=H matmul against the unsplit weight.
    pooled_ref[:, 0:Dt] = tok_pooled
    pooled_ref[:, Dt:Dt + Ds] = seg_pooled
    pooled_ref[:, Dt + Ds:Dt + Ds + F] = feat_ref[...]

    logits = jnp.dot(pooled_ref[...], w_ref[...],
                     preferred_element_type=jnp.float32) + b_ref[...]  # (B, C)

    # logits / T == logits * (1/T): one scalar reciprocal + VPU broadcast mul.
    inv_t = 1.0 / temp_ref[0, 0]
    o_ref[...] = logits * inv_t


def fused_forward(tok_ids, seg_ids, feat, tok_table, seg_table, w, b2, temp):
    """Single gridless pallas_call covering the entire forward pass."""
    B, S = tok_ids.shape
    V, Dt = tok_table.shape
    Ns, Ds = seg_table.shape
    F = feat.shape[1]
    H, C = w.shape
    assert H == Dt + Ds + F, (
        "classifier weight rows (%d) must equal Dt+Ds+F (%d)" % (H, Dt + Ds + F))
    assert b2.shape == (1, C) and temp.shape == (1, 1)

    itemsize = 4  # everything is 4-byte (f32 / i32)
    cost = pl.CostEstimate(
        flops=2 * B * (V * Dt + Ns * Ds + H * C),
        transcendentals=0,
        bytes_accessed=itemsize * (tok_ids.size + seg_ids.size + feat.size +
                                   tok_table.size + seg_table.size +
                                   w.size + b2.size + B * C))

    return pl.pallas_call(
        _fused_forward_kernel,
        out_shape=jax.ShapeDtypeStruct((B, C), jnp.float32),
        in_specs=[
            pl.BlockSpec(memory_space=pltpu.SMEM),   # temperature (1,1)
            pl.BlockSpec(memory_space=pltpu.VMEM),   # tok ids   (B,S) i32
            pl.BlockSpec(memory_space=pltpu.VMEM),   # seg ids   (B,S) i32
            pl.BlockSpec(memory_space=pltpu.VMEM),   # feat      (B,F)
            pl.BlockSpec(memory_space=pltpu.VMEM),   # tok table (V,Dt)
            pl.BlockSpec(memory_space=pltpu.VMEM),   # seg table (Ns,Ds)
            pl.BlockSpec(memory_space=pltpu.VMEM),   # W         (H,C)
            pl.BlockSpec(memory_space=pltpu.VMEM),   # bias      (1,C)
        ],
        out_specs=pl.BlockSpec(memory_space=pltpu.VMEM),
        scratch_shapes=[pltpu.VMEM((B, H), jnp.float32)],
        cost_estimate=cost,
    )(temp, tok_ids, seg_ids, feat, tok_table, seg_table, w, b2)


def init_params(key, vocab=32, n_segments=3, d_tok=64, d_seg=32, d_feat=32,
                n_classes=128):
    k1, k2, k3, k4 = jax.random.split(key, 4)
    H = d_tok + d_seg + d_feat
    return {
        "tok_emb": jax.random.normal(k1, (vocab, d_tok), jnp.float32) * 0.02,
        "seg_emb": jax.random.normal(k2, (n_segments, d_seg), jnp.float32) * 0.02,
        "w": jax.random.normal(k3, (H, n_classes), jnp.float32) * 0.05,
        # Stored in kernel-ready shapes so the per-forward wrapper adds no
        # reshape/convert ops (b is logically (C,), temperature is the
        # nn.Parameter(torch.ones(1) * 1.5)).
        "b": (jax.random.normal(k4, (n_classes,), jnp.float32) * 0.01
              ).reshape(1, n_classes),
        "temperature": jnp.full((1, 1), 1.5, jnp.float32),
    }


def model_with_temperature_forward(params, batch):
    # TODO(synk): the wrapped `self.model` in the PyTorch code is an opaque
    # user-supplied classifier; a synthetic embedding + mean-pool + linear head
    # is used here (whole forward runs as a single Pallas launch).
    return fused_forward(batch["input"], batch["segment_label"], batch["feat"],
                         params["tok_emb"], params["seg_emb"],
                         params["w"], params["b"], params["temperature"])


if __name__ == "__main__":
    key = jax.random.PRNGKey(0)
    pkey, k_tok, k_seg, k_feat = jax.random.split(key, 4)

    B, S, F = 8, 8, 32
    vocab, n_segments, n_classes = 32, 3, 128

    params = init_params(pkey, vocab=vocab, n_segments=n_segments,
                         d_feat=F, n_classes=n_classes)
    batch = {
        "input": jax.random.randint(k_tok, (B, S), 0, vocab, jnp.int32),
        "segment_label": jax.random.randint(k_seg, (B, S), 0, n_segments,
                                            jnp.int32),
        "feat": jax.random.normal(k_feat, (B, F), jnp.float32),
    }

    out = jax.block_until_ready(model_with_temperature_forward(params, batch))

    # Pure-JAX f32 reference (embedding gather + mean-pool + head + T-scale).
    tok_emb = jnp.take(params["tok_emb"], batch["input"], axis=0)
    seg_emb = jnp.take(params["seg_emb"], batch["segment_label"], axis=0)
    pooled = jnp.concatenate(
        [tok_emb.mean(axis=1), seg_emb.mean(axis=1), batch["feat"]], axis=-1)
    ref = (pooled @ params["w"] + params["b"]) / params["temperature"][0, 0]

    assert out.shape == (B, n_classes)
    assert jnp.allclose(out, ref, atol=2e-3, rtol=2e-3), (
        "max abs diff = %f" % float(jnp.max(jnp.abs(out - ref))))

    print("KERNEL_OK")
</pallas_src>

<mosaic_0001>
module attributes {stable_mosaic.version = 11 : i64} {
  func.func @_fused_forward_kernel(%arg0: memref<1x1xf32, #tpu.memory_space<smem>>, %arg1: memref<8x8xi32, #tpu.memory_space<vmem>>, %arg2: memref<8x8xi32, #tpu.memory_space<vmem>>, %arg3: memref<8x32xf32, #tpu.memory_space<vmem>>, %arg4: memref<32x64xf32, #tpu.memory_space<vmem>>, %arg5: memref<3x32xf32, #tpu.memory_space<vmem>>, %arg6: memref<128x128xf32, #tpu.memory_space<vmem>>, %arg7: memref<1x128xf32, #tpu.memory_space<vmem>>, %arg8: memref<8x128xf32, #tpu.memory_space<vmem>>, %arg9: memref<8x128xf32, #tpu.memory_space<vmem>>) attributes {dimension_semantics = [], scalar_prefetch = 0 : i64, scratch_operands = 1 : i64, tpu.core_type = #tpu.core_type<tc>} {
    %c0 = arith.constant 0 : index
    %c0_0 = arith.constant 0 : index
    %0 = vector.load %arg1[%c0, %c0_0] : memref<8x8xi32, #tpu.memory_space<vmem>>, vector<8x8xi32>
    %1 = vector.shape_cast %0 : vector<8x8xi32> to vector<8x8x1xi32>
    %2 = tpu.iota {dimensions = array<i32: 2>} : vector<8x8x32xi32>
    %3 = vector.broadcast %1 : vector<8x8x1xi32> to vector<8x8x32xi32>
    %4 = arith.cmpi eq, %3, %2 : vector<8x8x32xi32>
    %5 = arith.extui %4 : vector<8x8x32xi1> to vector<8x8x32xi32>
    %6 = arith.sitofp %5 : vector<8x8x32xi32> to vector<8x8x32xf32>
    %cst = arith.constant dense<0.000000e+00> : vector<8x32xf32>
    %7 = vector.multi_reduction <add>, %6, %cst [1] : vector<8x8x32xf32> to vector<8x32xf32>
    %c0_1 = arith.constant 0 : index
    %c0_2 = arith.constant 0 : index
    %8 = vector.load %arg4[%c0_1, %c0_2] : memref<32x64xf32, #tpu.memory_space<vmem>>, vector<32x64xf32>
    %cst_3 = arith.constant dense<0.000000e+00> : vector<8x64xf32>
    %9 = tpu.matmul %7, %8, %cst_3 {dimension_numbers = #tpu.dot_dimension_numbers<[1], [0], [0], [1], [0, 0, 1, 1], [], []>} : vector<8x32xf32>, vector<32x64xf32>, vector<8x64xf32> -> vector<8x64xf32>
    %cst_4 = arith.constant 1.250000e-01 : f32
    %10 = vector.broadcast %cst_4 : f32 to vector<8x64xf32>
    %11 = arith.mulf %9, %10 : vector<8x64xf32>
    %c0_5 = arith.constant 0 : index
    %c0_6 = arith.constant 0 : index
    %12 = vector.load %arg2[%c0_5, %c0_6] : memref<8x8xi32, #tpu.memory_space<vmem>>, vector<8x8xi32>
    %13 = vector.shape_cast %12 : vector<8x8xi32> to vector<8x8x1xi32>
    %14 = tpu.iota {dimensions = array<i32: 2>} : vector<8x8x3xi32>
    %15 = vector.broadcast %13 : vector<8x8x1xi32> to vector<8x8x3xi32>
    %16 = arith.cmpi eq, %15, %14 : vector<8x8x3xi32>
    %17 = arith.extui %16 : vector<8x8x3xi1> to vector<8x8x3xi32>
    %18 = arith.sitofp %17 : vector<8x8x3xi32> to vector<8x8x3xf32>
    %cst_7 = arith.constant dense<0.000000e+00> : vector<8x3xf32>
    %19 = vector.multi_reduction <add>, %18, %cst_7 [1] : vector<8x8x3xf32> to vector<8x3xf32>
    %c0_8 = arith.constant 0 : index
    %c0_9 = arith.constant 0 : index
    %20 = vector.load %arg5[%c0_8, %c0_9] : memref<3x32xf32, #tpu.memory_space<vmem>>, vector<3x32xf32>
    %cst_10 = arith.constant dense<0.000000e+00> : vector<8x32xf32>
    %21 = tpu.matmul %19, %20, %cst_10 {dimension_numbers = #tpu.dot_dimension_numbers<[1], [0], [0], [1], [0, 0, 1, 1], [], []>} : vector<8x3xf32>, vector<3x32xf32>, vector<8x32xf32> -> vector<8x32xf32>
    %cst_11 = arith.constant 1.250000e-01 : f32
    %22 = vector.broadcast %cst_11 : f32 to vector<8x32xf32>
    %23 = arith.mulf %21, %22 : vector<8x32xf32>
    %c0_12 = arith.constant 0 : index
    %c0_13 = arith.constant 0 : index
    %24 = vector.load %arg9[%c0_12, %c0_13] : memref<8x128xf32, #tpu.memory_space<vmem>>, vector<8x64xf32>
    tpu.vector_store %arg9[%c0_12, %c0_13], %11 {strides = array<i32>} : memref<8x128xf32, #tpu.memory_space<vmem>>, vector<8x64xf32>,
    %c0_14 = arith.constant 0 : index
    %c64 = arith.constant 64 : index
    %25 = vector.load %arg9[%c0_14, %c64] : memref<8x128xf32, #tpu.memory_space<vmem>>, vector<8x32xf32>
    tpu.vector_store %arg9[%c0_14, %c64], %23 {strides = array<i32>} : memref<8x128xf32, #tpu.memory_space<vmem>>, vector<8x32xf32>,
    %c0_15 = arith.constant 0 : index
    %c0_16 = arith.constant 0 : index
    %26 = vector.load %arg3[%c0_15, %c0_16] : memref<8x32xf32, #tpu.memory_space<vmem>>, vector<8x32xf32>
    %c0_17 = arith.constant 0 : index
    %c96 = arith.constant 96 : index
    %27 = vector.load %arg9[%c0_17, %c96] : memref<8x128xf32, #tpu.memory_space<vmem>>, vector<8x32xf32>
    tpu.vector_store %arg9[%c0_17, %c96], %26 {strides = array<i32>} : memref<8x128xf32, #tpu.memory_space<vmem>>, vector<8x32xf32>,
    %c0_18 = arith.constant 0 : index
    %c0_19 = arith.constant 0 : index
    %28 = vector.load %arg9[%c0_18, %c0_19] : memref<8x128xf32, #tpu.memory_space<vmem>>, vector<8x128xf32>
    %c0_20 = arith.constant 0 : index
    %c0_21 = arith.constant 0 : index
    %29 = vector.load %arg6[%c0_20, %c0_21] : memref<128x128xf32, #tpu.memory_space<vmem>>, vector<128x128xf32>
    %cst_22 = arith.constant dense<0.000000e+00> : vector<8x128xf32>
    %30 = tpu.matmul %28, %29, %cst_22 {dimension_numbers = #tpu.dot_dimension_numbers<[1], [0], [0], [1], [0, 0, 1, 1], [], []>} : vector<8x128xf32>, vector<128x128xf32>, vector<8x128xf32> -> vector<8x128xf32>
    %c0_23 = arith.constant 0 : index
    %c0_24 = arith.constant 0 : index
    %31 = vector.load %arg7[%c0_23, %c0_24] : memref<1x128xf32, #tpu.memory_space<vmem>>, vector<1x128xf32>
    %32 = vector.broadcast %31 : vector<1x128xf32> to vector<8x128xf32>
    %33 = arith.addf %30, %32 : vector<8x128xf32>
    %c0_25 = arith.constant 0 : index
    %c0_26 = arith.constant 0 : index
    %34 = memref.load %arg0[%c0_25, %c0_26] : memref<1x1xf32, #tpu.memory_space<smem>>
    %cst_27 = arith.constant 1.000000e+00 : f32
    %35 = arith.divf %cst_27, %34 : f32
    %36 = vector.broadcast %35 : f32 to vector<8x128xf32>
    %37 = arith.mulf %33, %36 : vector<8x128xf32>
    %c0_28 = arith.constant 0 : index
    %c0_29 = arith.constant 0 : index
    %38 = vector.load %arg8[%c0_28, %c0_29] : memref<8x128xf32, #tpu.memory_space<vmem>>, vector<8x128xf32>
    tpu.vector_store %arg8[%c0_28, %c0_29], %37 {strides = array<i32>} : memref<8x128xf32, #tpu.memory_space<vmem>>, vector<8x128xf32>,
    return
  }
}

</mosaic_0001>

<bundles_post_ra>
// kernel: tpu_custom_call.1
= control target key start
LH: loop header
LB: loop body
LE: loop exit
PB: predicated region body
PF: predicated region fallthrough
CT: control target
= control target key end

     0   :  { %14 = vsyncpa [#allocation5], 0  ;;  %s1118_s0 = inlined_call_operand.<no memory space> [shape: f32[1,1], index: 0, kind: input, shape index: {}]   ;;  %s1119_s1 = inlined_call_operand.hbm [shape: s32[8,8], index: 1, kind: input, shape index: {}]   ;;  %s1120_s2 = inlined_call_operand.hbm [shape: s32[8,8], index: 2, kind: input, shape index: {}]   ;;  %s1121_s3 = inlined_call_operand.hbm [shape: f32[8,32], index: 3, kind: input, shape index: {}]   ;;  %s1122_s4 = inlined_call_operand.hbm [shape: f32[32,64], index: 4, kind: input, shape index: {}]   ;;  %s1123_s5 = inlined_call_operand.vmem [shape: f32[3,32], index: 5, kind: input, shape index: {}]   ;;  %s1124_s6 = inlined_call_operand.hbm [shape: f32[128,128], index: 6, kind: input, shape index: {}]   ;;  %s1125_s7 = inlined_call_operand.vmem [shape: f32[1,128], index: 7, kind: input, shape index: {}]   ;;  %s1126_s8 = inlined_call_operand.hbm [shape: f32[8,128], index: 8, kind: output, shape index: {}]  }
   0x1   :  { %15 = vsyncpa [#allocation8], 0 }
   0x2   :  { %16 = vsyncpa [#allocation11], 0 }
   0x3   :  { %17 = vsyncpa [#allocation6], 0  ;;  %s935_s27 = smov [#allocation7]   ;;  %s936_s29 = smov [#allocation10]  }
   0x4   :  { %s36_s28 = sshll.u32 %s935_s27, 4  ;;  %s55_s30 = sshll.u32 %s936_s29, 4  ;;  %s37_s28 = int_to_ptr.vmem [resolvable:$true] %s36_s28  ;;  %s56_s30 = int_to_ptr.vmem [resolvable:$true] %s55_s30 }
   0x5   :  { %s815_s9 = scalar_lea.vmem %s37_s28, 128  ;;  %p820_p1 = scmp.lt.s32.totalorder %s37_s28, %s37_s28 }
   0x6   :  { %p816_p0 = scmp.ne.s32.totalorder %s37_s28, %s815_s9  ;;  %p821_p2 = scmp.lt.s32.totalorder %s815_s9, %s815_s9 }
   0x8   :  { %p822_p3 = por %p821_p2, %p820_p1 }
   0xa   :  { %p823_p4 = pnand %p822_p3, %p816_p0 }
   0xc   :  { %826 = shalt.err (!%p823_p4)
}
   0xd   :  { %39 = dma.hbm_to_vmem [thread:$0]  %s1120_s2, 128, %s37_s28, [#allocation8]  }
   0xe   :  { %s835_s12 = scalar_lea.vmem %s56_s30, 512  ;;  %p840_p6 = scmp.lt.s32.totalorder %s56_s30, %s56_s30 }
   0xf   :  { %p836_p5 = scmp.ne.s32.totalorder %s56_s30, %s835_s12  ;;  %p841_p7 = scmp.lt.s32.totalorder %s835_s12, %s835_s12 }
  0x11   :  { %p842_p8 = por %p841_p7, %p840_p6 }
  0x13   :  { %p843_p9 = pnand %p842_p8, %p836_p5 }
  0x15   :  { %846 = shalt.err (!%p843_p9)
}
  0x16   :  { %s937_s13 = smov 128   ;;  %s938_s14 = smov 8  }
  0x17   :  { %61 = dma.hbm_to_vmem [thread:$0]  %s1122_s4, 512, %s56_s30, [#allocation11], %s937_s13, %s937_s13, %s938_s14  }
  0x18   :  { %s939_s17 = smov [#allocation4]   ;;  %s940_s19 = smov [#allocation9]  }
  0x19   :  { %s26_s18 = sshll.u32 %s939_s17, 4  ;;  %s46_s2 = sshll.u32 %s940_s19, 4  ;;  %s27_s18 = int_to_ptr.vmem [resolvable:$true] %s26_s18  ;;  %s47_s2 = int_to_ptr.vmem [resolvable:$true] %s46_s2 }
  0x1a   :  { %s855_s20 = scalar_lea.vmem %s27_s18, 128  ;;  %p860_p11 = scmp.lt.s32.totalorder %s27_s18, %s27_s18 }
  0x1b   :  { %p856_p10 = scmp.ne.s32.totalorder %s27_s18, %s855_s20  ;;  %p861_p12 = scmp.lt.s32.totalorder %s855_s20, %s855_s20 }
  0x1d   :  { %p862_p13 = por %p861_p12, %p860_p11 }
  0x1f   :  { %p863_p0 = pnand %p862_p13, %p856_p10 }
  0x21   :  { %866 = shalt.err (!%p863_p0)
}
  0x22   :  { %29 = dma.hbm_to_vmem [thread:$0]  %s1119_s1, 128, %s27_s18, [#allocation5]  }
  0x23   :  { %s875_s23 = scalar_lea.vmem %s47_s2, 128  ;;  %p880_p2 = scmp.lt.s32.totalorder %s47_s2, %s47_s2 }
  0x24   :  { %p876_p1 = scmp.ne.s32.totalorder %s47_s2, %s875_s23  ;;  %p881_p3 = scmp.lt.s32.totalorder %s875_s23, %s875_s23 }
  0x26   :  { %p882_p4 = por %p881_p3, %p880_p2 }
  0x28   :  { %p883_p5 = pnand %p882_p4, %p876_p1 }
  0x2a   :  { %886 = shalt.err (!%p883_p5)
}
  0x2b   :  { %49 = dma.hbm_to_vmem [thread:$0]  %s1121_s3, 128, %s47_s2, [#allocation8]  }
  0x2c   :  { %s941_s25 = smov [#allocation12]  }
  0x2d   :  { %s69_s26 = sshll.u32 %s941_s25, 4  ;;  %s70_s26 = int_to_ptr.vmem [resolvable:$true] %s69_s26 }
  0x2e   :  { %s895_s27 = scalar_lea.vmem %s70_s26, 2048  ;;  %p900_p7 = scmp.lt.s32.totalorder %s70_s26, %s70_s26 }
  0x2f   :  { %p896_p6 = scmp.ne.s32.totalorder %s70_s26, %s895_s27  ;;  %p901_p8 = scmp.lt.s32.totalorder %s895_s27, %s895_s27 }
  0x31   :  { %p902_p9 = por %p901_p8, %p900_p7 }
  0x33   :  { %p903_p10 = pnand %p902_p9, %p896_p6 }
  0x35   :  { %906 = shalt.err (!%p903_p10)
}
  0x36   :  { %75 = dma.hbm_to_vmem [thread:$0]  %s1124_s6, 2048, %s70_s26, [#allocation11], %s937_s13, %s937_s13, %s938_s14  }
  0x37   :  { %927 = dma.done.wait [#allocation5], 128  }
  0x38   :  { %928 = vsyncadd [#allocation5], 4294967168 }
  0x39   :  { %929 = dma.done.wait [#allocation8], 256  }
  0x3a   :  { %930 = vsyncadd [#allocation8], 4294967040 }
  0x3b   :  { %931 = dma.done.wait [#allocation11], 2560  }
  0x3c   :  { %932 = vsyncadd [#allocation11], 4294964736  ;;  %v94_v0 = vlaneseq  ;;  %v942_v1 = vmov 0.0   ;;  %v93_v7 = vld [vmem:[#allocation4] sm:$0xff]  ;;  %v332_v16 = vld [vmem:[#allocation7] sm:$0xff]  ;;  %vm943_vm0 = vmmov 0  }
  0x3d   :  { %740 = vmatprep.subr.mxu0 %v942_v1  ;;  %756 = vmatprep.subr.mxu1 %v942_v1  ;;  %v236_v27 = vld [vmem:[#allocation10 + $0x18] sm:$0xff]  ;;  %v235_v30 = vld [vmem:[#allocation10 + $0x10] sm:$0xff]  ;;  %v234_v31 = vld [vmem:[#allocation10 + $0x8] sm:$0xff]  ;;  %vm176_vm1 = vcmask 261120   ;;  %vm413_vm8 = vcmask 23552   ;;  %vm245_vm13 = vcmask 1041409  }
  0x3e   :  { %v95_v2 = vshrl.u32 %v94_v0, 7  ;;  %741 = vmatpush3.msra.mxu0 %v236_v27  ;;  %v233_v32 = vld [vmem:[#allocation10] sm:$0xff]  ;;  %748 = vmatprep.mubr.msk.f32.mxu0 %vm943_vm0, %v942_v1  ;;  %v1023_v33 = vand.u32 127, %v94_v0  ;;  %vm247_vm14 = vcmask 1042434   ;;  %s945_s9 = smov 64  }
  0x3f   :  { %742 = vmatprep.subr.mxu0 %v942_v1  ;;  %788 = vmatprep.mubr.msk.f32.mxu1 %vm943_vm0, %v942_v1 }
  0x40   :  { %v110_v3 = vsub.s32 2, %v95_v2  ;;  %v96_v4 = vsub.s32 0, %v95_v2  ;;  %v117_v5 = vsub.s32 3, %v95_v2  ;;  %v103_v6 = vsub.s32 1, %v95_v2  ;;  %743 = vmatpush3.msra.mxu0 %v235_v30 }
  0x41   :  { %v131_v12 = vsub.s32 5, %v95_v2  ;;  %v124_v13 = vsub.s32 4, %v95_v2  ;;  %v138_v19 = vsub.s32 6, %v95_v2  ;;  %v145_v22 = vsub.s32 7, %v95_v2  ;;  %744 = vmatprep.subr.mxu0 %v942_v1 }
  0x42   :  { %v111_v8 = vrot.slane %v93_v7, %v110_v3  ;;  %v97_v9 = vrot.slane %v93_v7, %v96_v4  ;;  %v118_v10 = vrot.slane %v93_v7, %v117_v5  ;;  %v104_v11 = vrot.slane %v93_v7, %v103_v6  ;;  %745 = vmatpush3.msra.mxu0 %v234_v31 }
  0x43   :  { %v132_v14 = vrot.slane %v93_v7, %v131_v12  ;;  %v125_v15 = vrot.slane %v93_v7, %v124_v13  ;;  %v343_v17 = vrot.slane %v332_v16, %v103_v6  ;;  %v336_v18 = vrot.slane %v332_v16, %v96_v4  ;;  %746 = vmatprep.subr.mxu0 %v942_v1 }
  0x44   :  { %113 = vbcast.lane.b32.xlu1 %v111_v8, 256  ;;  %99 = vbcast.lane.b32.xlu0 %v97_v9, 256  ;;  %v350_v20 = vrot.slane %v332_v16, %v110_v3  ;;  %v139_v21 = vrot.slane %v93_v7, %v138_v19  ;;  %v357_v23 = vrot.slane %v332_v16, %v117_v5 }
  0x45   :  { %v146_v24 = vrot.slane %v93_v7, %v145_v22  ;;  %v371_v25 = vrot.slane %v332_v16, %v131_v12  ;;  %v364_v26 = vrot.slane %v332_v16, %v124_v13  ;;  %v385_v28 = vrot.slane %v332_v16, %v145_v22  ;;  %747 = vmatpush3.msra.mxu0 %v233_v32 }
  0x46   :  { %v378_v29 = vrot.slane %v332_v16, %v138_v19  ;;  %751 = vmatprep.subr.mxu0 %v942_v1 }
  0x48   :  { %120 = vbcast.lane.b32.xlu1 %v118_v10, 256  ;;  %106 = vbcast.lane.b32.xlu0 %v104_v11, 256 }
  0x4c   :  { %134 = vbcast.lane.b32.xlu1 %v132_v14, 256  ;;  %127 = vbcast.lane.b32.xlu0 %v125_v15, 256 }
  0x50   :  { %345 = vbcast.lane.b32.xlu1 %v343_v17, 256  ;;  %338 = vbcast.lane.b32.xlu0 %v336_v18, 256 }
  0x54   :  { %352 = vbcast.lane.b32.xlu1 %v350_v20, 256  ;;  %141 = vbcast.lane.b32.xlu0 %v139_v21, 256 }
  0x58   :  { %359 = vbcast.lane.b32.xlu1 %v357_v23, 256  ;;  %148 = vbcast.lane.b32.xlu0 %v146_v24, 256 }
  0x5c   :  { %373 = vbcast.lane.b32.xlu1 %v371_v25, 256  ;;  %366 = vbcast.lane.b32.xlu0 %v364_v26, 256 }
  0x60   :  { %387 = vbcast.lane.b32.xlu1 %v385_v28, 256  ;;  %380 = vbcast.lane.b32.xlu0 %v378_v29, 256 }
  0xb6   :  { %v114_v34 = vpop.permute.xlu1 %113  ;;  %v100_v35 = vpop.permute.xlu0 %99 }
  0xb7   :  { %vm154_vm2 = vcmp.eq.s32.totalorder %v114_v34, %v1023_v33  ;;  %vm152_vm3 = vcmp.eq.s32.totalorder %v100_v35, %v1023_v33 }
  0xb8   :  { %v698_v36 = vsel %vm154_vm2, 1.0, %v942_v1  ;;  %v696_v37 = vsel %vm152_vm3, 1.0, %v942_v1  ;;  %vm249_vm3 = vcmask 1043459  }
  0xb9   :  { %v191_v38 = vsel %vm176_vm1, %v698_v36, 0.0  ;;  %v177_v39 = vsel %vm176_vm1, %v696_v37, 0.0 }
  0xba   :  { %v192_v40 = vrot.slane %v191_v38, 4  ;;  %v178_v41 = vrot.slane %v177_v39, 4  ;;  %v121_v42 = vpop.permute.xlu1 %120  ;;  %v107_v43 = vpop.permute.xlu0 %106 }
  0xbb   :  { %vm155_vm4 = vcmp.eq.s32.totalorder %v121_v42, %v1023_v33  ;;  %vm153_vm5 = vcmp.eq.s32.totalorder %v107_v43, %v1023_v33 }
  0xbc   :  { %v193_v44 = vadd.f32 %v192_v40, %v191_v38  ;;  %v179_v45 = vadd.f32 %v178_v41, %v177_v39  ;;  %v699_v46 = vsel %vm155_vm4, 1.0, %v942_v1  ;;  %v697_v47 = vsel %vm153_vm5, 1.0, %v942_v1 }
  0xbd   :  { %v198_v48 = vsel %vm176_vm1, %v699_v46, 0.0  ;;  %v184_v49 = vsel %vm176_vm1, %v697_v47, 0.0  ;;  %vm251_vm4 = vcmask 1044484  }
  0xbe   :  { %v180_v50 = vrot.slane %v179_v45, 2  ;;  %v199_v51 = vrot.slane %v198_v48, 4  ;;  %v185_v52 = vrot.slane %v184_v49, 4  ;;  %v135_v53 = vpop.permute.xlu1 %134  ;;  %v128_v54 = vpop.permute.xlu0 %127  ;;  %v194_v55 = vrot.slane %v193_v44, 2 }
  0xbf   :  { %vm157_vm6 = vcmp.eq.s32.totalorder %v135_v53, %v1023_v33  ;;  %vm156_vm7 = vcmp.eq.s32.totalorder %v128_v54, %v1023_v33 }
  0xc0   :  { %v200_v56 = vadd.f32 %v199_v51, %v198_v48  ;;  %v186_v57 = vadd.f32 %v185_v52, %v184_v49  ;;  %v701_v58 = vsel %vm157_vm6, 1.0, %v942_v1  ;;  %v700_v59 = vsel %vm156_vm7, 1.0, %v942_v1 }
  0xc1   :  { %v181_v60 = vadd.f32 %v180_v50, %v179_v45  ;;  %v212_v2 = vsel %vm176_vm1, %v701_v58, 0.0  ;;  %v205_v3 = vsel %vm176_vm1, %v700_v59, 0.0  ;;  %v195_v4 = vadd.f32 %v194_v55, %v193_v44 }
  0xc2   :  { %v201_v61 = vrot.slane %v200_v56, 2  ;;  %v187_v62 = vrot.slane %v186_v57, 2  ;;  %v346_v63 = vpop.permute.xlu1 %345  ;;  %v339_v0 = vpop.permute.xlu0 %338  ;;  %v213_v6 = vrot.slane %v212_v2, 4  ;;  %v206_v7 = vrot.slane %v205_v3, 4 }
  0xc3   :  { %vm390_vm9 = vcmp.eq.s32.totalorder %v346_v63, %v1023_v33  ;;  %vm389_vm10 = vcmp.eq.s32.totalorder %v339_v0, %v1023_v33  ;;  %v182_v10 = vrot.slane %v181_v60, 1  ;;  %v196_v21 = vrot.slane %v195_v4, 1 }
  0xc4   :  { %v188_v5 = vadd.f32 %v187_v62, %v186_v57  ;;  %v706_v8 = vsel %vm390_vm9, 1.0, %v942_v1  ;;  %v705_v9 = vsel %vm389_vm10, 1.0, %v942_v1  ;;  %v202_v16 = vadd.f32 %v201_v61, %v200_v56 }
  0xc5   :  { %v421_v12 = vsel %vm413_vm8, %v706_v8, 0.0  ;;  %v414_v13 = vsel %vm413_vm8, %v705_v9, 0.0  ;;  %v214_v17 = vadd.f32 %v213_v6, %v212_v2  ;;  %v207_v18 = vadd.f32 %v206_v7, %v205_v3 }
  0xc6   :  { %v189_v11 = vrot.slane %v188_v5, 1  ;;  %v353_v14 = vpop.permute.xlu1 %352  ;;  %v142_v15 = vpop.permute.xlu0 %141  ;;  %v422_v19 = vrot.slane %v421_v12, 4  ;;  %v415_v23 = vrot.slane %v414_v13, 4  ;;  %v183_v24 = vadd.f32 %v182_v10, %v181_v60 }
  0xc7   :  { %vm391_vm11 = vcmp.eq.s32.totalorder %v353_v14, %v1023_v33  ;;  %vm158_vm12 = vcmp.eq.s32.totalorder %v142_v15, %v1023_v33  ;;  %v215_v22 = vrot.slane %v214_v17, 2  ;;  %v208_v25 = vrot.slane %v207_v18, 2 }
  0xc8   :  { %v190_v20 = vadd.f32 %v189_v11, %v188_v5  ;;  %v707_v26 = vsel %vm391_vm11, 1.0, %v942_v1  ;;  %v702_v27 = vsel %vm158_vm12, 1.0, %v942_v1  ;;  %v203_v30 = vrot.slane %v202_v16, 1 }
  0xc9   :  { %v423_v31 = vadd.f32 %v422_v19, %v421_v12  ;;  %v428_v34 = vsel %vm413_vm8, %v707_v26, 0.0  ;;  %v219_v35 = vsel %vm176_vm1, %v702_v27, 0.0  ;;  %v197_v36 = vadd.f32 %v196_v21, %v195_v4 }
  0xca   :  { %v360_v28 = vpop.permute.xlu1 %359  ;;  %v149_v29 = vpop.permute.xlu0 %148  ;;  %v246_v32 = vsel %vm245_vm13, %v190_v20, %v183_v24  ;;  %v216_v37 = vadd.f32 %v215_v22, %v214_v17  ;;  %v416_v38 = vadd.f32 %v415_v23, %v414_v13  ;;  %v429_v39 = vrot.slane %v428_v34, 4 }
  0xcb   :  { %vm392_vm15 = vcmp.eq.s32.totalorder %v360_v28, %v1023_v33  ;;  %v209_v40 = vadd.f32 %v208_v25, %v207_v18  ;;  %v220_v41 = vrot.slane %v219_v35, 4  ;;  %vm159_vm2 = vcmp.eq.s32.totalorder %v149_v29, %v1023_v33 }
  0xcc   :  { %v708_v42 = vsel %vm392_vm15, 1.0, %v942_v1  ;;  %v204_v44 = vadd.f32 %v203_v30, %v202_v16  ;;  %v248_v45 = vsel %vm247_vm14, %v197_v36, %v246_v32  ;;  %v424_v46 = vrot.slane %v423_v31, 2 }
  0xcd   :  { %v430_v48 = vadd.f32 %v429_v39, %v428_v34  ;;  %v221_v49 = vadd.f32 %v220_v41, %v219_v35  ;;  %v435_v50 = vsel %vm413_vm8, %v708_v42, 0.0  ;;  %v703_v51 = vsel %vm159_vm2, 1.0, %v942_v1 }
  0xce   :  { %v374_v43 = vpop.permute.xlu1 %373  ;;  %v367_v47 = vpop.permute.xlu0 %366  ;;  %v217_v52 = vrot.slane %v216_v37, 1  ;;  %v417_v53 = vrot.slane %v416_v38, 2  ;;  %v436_v54 = vrot.slane %v435_v50, 4  ;;  %v226_v55 = vsel %vm176_vm1, %v703_v51, 0.0 }
  0xcf   :  { %v210_v56 = vrot.slane %v209_v40, 1  ;;  %v222_v57 = vrot.slane %v221_v49, 2  ;;  %v227_v58 = vrot.slane %v226_v55, 4  ;;  %vm394_vm5 = vcmp.eq.s32.totalorder %v374_v43, %v1023_v33 }
  0xd0   :  { %v425_v59 = vadd.f32 %v424_v46, %v423_v31  ;;  %v437_v60 = vadd.f32 %v436_v54, %v435_v50  ;;  %v710_v61 = vsel %vm394_vm5, 1.0, %v942_v1  ;;  %vm393_vm6 = vcmp.eq.s32.totalorder %v367_v47, %v1023_v33  ;;  %v470_v46 = vld [vmem:[%s1123_s5] sm:$0x7]  ;;  %s944_s5 = smov 96  }
  0xd1   :  { %vm253_vm7 = vcmask 1045509   ;;  %v431_v63 = vrot.slane %v430_v48, 2  ;;  %v223_v0 = vadd.f32 %v222_v57, %v221_v49  ;;  %v228_v2 = vadd.f32 %v227_v58, %v226_v55 }
  0xd2   :  { %v388_v62 = vpop.permute.xlu1 %387  ;;  %v449_v3 = vsel %vm413_vm8, %v710_v61, 0.0  ;;  %vm255_vm9 = vcmask 1046534   ;;  %v418_v4 = vadd.f32 %v417_v53, %v416_v38  ;;  %v438_v5 = vrot.slane %v437_v60, 2  ;;  %v381_v8 = vpop.permute.xlu0 %380 }
  0xd3   :  { %v450_v6 = vrot.slane %v449_v3, 4  ;;  %v709_v7 = vsel %vm393_vm6, 1.0, %v942_v1  ;;  %vm257_vm10 = vcmask 1047559   ;;  %v218_v9 = vadd.f32 %v217_v52, %v216_v37 }
  0xd4   :  { %v229_v10 = vrot.slane %v228_v2, 2  ;;  %v442_v11 = vsel %vm413_vm8, %v709_v7, 0.0  ;;  %vm396_vm11 = vcmp.eq.s32.totalorder %v388_v62, %v1023_v33  ;;  %v211_v12 = vadd.f32 %v210_v56, %v209_v40  ;;  %v593_v7 = vld [vmem:[#allocation12 + $0x70] sm:$0xff] }
  0xd5   :  { %v224_v13 = vrot.slane %v223_v0, 1  ;;  %v451_v14 = vadd.f32 %v450_v6, %v449_v3  ;;  %v443_v15 = vrot.slane %v442_v11, 4  ;;  %v432_v16 = vadd.f32 %v431_v63, %v430_v48  ;;  %v594_v6 = vld [vmem:[#allocation12 + $0x78] sm:$0xff] }
  0xd6   :  { %v230_v17 = vadd.f32 %v229_v10, %v228_v2  ;;  %v712_v18 = vsel %vm396_vm11, 1.0, %v942_v1  ;;  %vm395_vm12 = vcmp.eq.s32.totalorder %v381_v8, %v1023_v33  ;;  %v426_v19 = vrot.slane %v425_v59, 1  ;;  %757 = vmatpush3.msra.mxu1 %v594_v6  ;;  %v592_v8 = vld [vmem:[#allocation12 + $0x68] sm:$0xff]  ;;  %v590_v10 = vld [vmem:[#allocation12 + $0x58] sm:$0xff] }
  0xd7   :  { %v439_v20 = vadd.f32 %v438_v5, %v437_v60  ;;  %v452_v21 = vrot.slane %v451_v14, 2  ;;  %v444_v22 = vadd.f32 %v443_v15, %v442_v11  ;;  %v463_v24 = vsel %vm413_vm8, %v712_v18, 0.0  ;;  %v571_v5 = vld [vmem:[#allocation9] sm:$0xff]  ;;  %758 = vmatprep.subr.mxu1 %v942_v1  ;;  %v589_v11 = vld [vmem:[#allocation12 + $0x50] sm:$0xff] }
  0xd8   :  { %v231_v23 = vrot.slane %v230_v17, 1  ;;  %v711_v25 = vsel %vm395_vm12, 1.0, %v942_v1  ;;  %v250_v26 = vsel %vm249_vm3, %v204_v44, %v248_v45  ;;  %v419_v27 = vrot.slane %v418_v4, 1  ;;  %573 = vrot.lane.b32.xlu1 %v571_v5, %s944_s5  ;;  %759 = vmatpush3.msra.mxu1 %v593_v7  ;;  %v585_v15 = vld [vmem:[#allocation12 + $0x30] sm:$0xff] }
  0xd9   :  { %v225_v28 = vadd.f32 %v224_v13, %v223_v0  ;;  %v445_v29 = vrot.slane %v444_v22, 2  ;;  %v464_v30 = vrot.slane %v463_v24, 4  ;;  %v433_v31 = vrot.slane %v432_v16, 1  ;;  %760 = vmatprep.subr.mxu1 %v942_v1  ;;  %v587_v13 = vld [vmem:[#allocation12 + $0x40] sm:$0xff] }
  0xda   :  { %v232_v32 = vadd.f32 %v231_v23, %v230_v17  ;;  %v456_v34 = vsel %vm413_vm8, %v711_v25, 0.0  ;;  %v252_v33 = vsel %vm251_vm4, %v211_v12, %v250_v26  ;;  %v440_v35 = vrot.slane %v439_v20, 1  ;;  %761 = vmatpush3.msra.mxu1 %v592_v8  ;;  %v588_v12 = vld [vmem:[#allocation12 + $0x48] sm:$0xff] }
  0xdb   :  { %v453_v36 = vadd.f32 %v452_v21, %v451_v14  ;;  %v446_v37 = vadd.f32 %v445_v29, %v444_v22  ;;  %v465_v38 = vadd.f32 %v464_v30, %v463_v24  ;;  %v427_v39 = vadd.f32 %v426_v19, %v425_v59  ;;  %762 = vmatprep.subr.mxu1 %v942_v1  ;;  %v586_v14 = vld [vmem:[#allocation12 + $0x38] sm:$0xff]  ;;  %v583_v19 = vld [vmem:[#allocation12 + $0x20] sm:$0xff]  ;;  %v581_v22 = vld [vmem:[#allocation12 + $0x10] sm:$0xff] }
  0xdc   :  { %v457_v40 = vrot.slane %v456_v34, 4  ;;  %v254_v41 = vsel %vm253_vm7, %v218_v9, %v252_v33  ;;  %vm488_vm15 = vcmask 1042432   ;;  %v420_v42 = vadd.f32 %v419_v27, %v418_v4  ;;  %v591_v9 = vld [vmem:[#allocation12 + $0x60] sm:$0xff]  ;;  %v582_v21 = vld [vmem:[#allocation12 + $0x18] sm:$0xff]  ;;  %v580_v23 = vld [vmem:[#allocation12 + $0x8] sm:$0xff] }
  0xdd   :  { %v447_v43 = vrot.slane %v446_v37, 1  ;;  %v466_v44 = vrot.slane %v465_v38, 2  ;;  %v256_v45 = vsel %vm255_vm9, %v225_v28, %v254_v41  ;;  %v434_v47 = vadd.f32 %v433_v31, %v432_v16  ;;  %763 = vmatpush3.msra.mxu1 %v591_v9  ;;  %v584_v16 = vld [vmem:[#allocation12 + $0x28] sm:$0xff]  ;;  %v579_v24 = vld [vmem:[#allocation12] sm:$0xff] }
  0xde   :  { %v458_v48 = vadd.f32 %v457_v40, %v456_v34  ;;  %v258_v49 = vsel %vm257_vm10, %v232_v32, %v256_v45  ;;  %v441_v50 = vadd.f32 %v440_v35, %v439_v20  ;;  %v454_v51 = vrot.slane %v453_v36, 1  ;;  %764 = vmatprep.subr.mxu1 %v942_v1  ;;  %v715_v32 = vld [vmem:[%s1125_s7] ss:$0 sm:$0xff] }
  0xdf   :  { %v467_v52 = vadd.f32 %v466_v44, %v465_v38  ;;  %749 = vmatmul.mubr.msk.f32.vlgmr.msra.gmra.mxu0 %vm176_vm1, %v258_v49  ;;  %v448_v53 = vadd.f32 %v447_v43, %v446_v37  ;;  %v479_v55 = vsel %vm245_vm13, %v427_v39, %v420_v42  ;;  %765 = vmatpush3.msra.mxu1 %v590_v10  ;;  %v673_v25 = vstv %s1118_s0  ;;  %s946_s0 = smov [#allocation13]  }
  0xe0   :  { %v459_v54 = vrot.slane %v458_v48, 2  ;;  %752 = vmatpush3.msk.msra.mxu0 %vm488_vm15, %v470_v46  ;;  %753 = vmatprep.mubr.msk.f32.mxu0 %vm943_vm0, %v942_v1  ;;  %v480_v57 = vsel %vm247_vm14, %v434_v47, %v479_v55  ;;  %v455_v60 = vadd.f32 %v454_v51, %v453_v36  ;;  %vm563_vm0 = vcmask 523264   ;;  %s685_s13 = sshll.u32 %s946_s0, 4  ;;  %s686_s13 = int_to_ptr.vmem [resolvable:$true] %s685_s13 }
  0xe1   :  { %v468_v56 = vrot.slane %v467_v52, 1  ;;  %v481_v59 = vsel %vm249_vm3, %v441_v50, %v480_v57  ;;  %766 = vmatprep.subr.mxu1 %v942_v1  ;;  %805 = vrcp.f32 %v673_v25  ;;  %vm569_vm1 = vcmask 785920   ;;  %s907_s14 = scalar_lea.vmem %s686_s13, 128  ;;  %p912_p12 = scmp.lt.s32.totalorder %s686_s13, %s686_s13 }
  0xe2   :  { %v460_v58 = vadd.f32 %v459_v54, %v458_v48  ;;  %v482_v61 = vsel %vm251_vm4, %v448_v53, %v481_v59  ;;  %767 = vmatpush3.msra.mxu1 %v589_v11  ;;  %p908_p11 = scmp.ne.s32.totalorder %s686_s13, %s907_s14  ;;  %p913_p13 = scmp.lt.s32.totalorder %s907_s14, %s907_s14 }
  0xe3   :  { %v469_v63 = vadd.f32 %v468_v56, %v467_v52  ;;  %v483_v2 = vsel %vm253_vm7, %v455_v60, %v482_v61  ;;  %768 = vmatprep.subr.mxu1 %v942_v1 }
  0xe4   :  { %v461_v62 = vrot.slane %v460_v58, 1  ;;  %769 = vmatpush3.msra.mxu1 %v588_v12  ;;  %p914_p0 = por %p913_p13, %p912_p12 }
  0xe5   :  { %770 = vmatprep.subr.mxu1 %v942_v1 }
  0xe6   :  { %v462_v0 = vadd.f32 %v461_v62, %v460_v58  ;;  %771 = vmatpush3.msra.mxu1 %v587_v13  ;;  %p915_p1 = pnand %p914_p0, %p908_p11 }
  0xe7   :  { %772 = vmatprep.subr.mxu1 %v942_v1 }
  0xe8   :  { %v484_v3 = vsel %vm255_vm9, %v462_v0, %v483_v2  ;;  %773 = vmatpush3.msra.mxu1 %v586_v14 }
  0xe9   :  { %v485_v4 = vsel %vm257_vm10, %v469_v63, %v484_v3  ;;  %774 = vmatprep.subr.mxu1 %v942_v1 }
  0xea   :  { %754 = vmatmul.mubr.msk.f32.vlgmr.msra.gmra.mxu0 %vm413_vm8, %v485_v4  ;;  %775 = vmatpush3.msra.mxu1 %v585_v15  ;;  %vm576_vm8 = vcmask 1048320  }
  0xeb   :  { %776 = vmatprep.subr.mxu1 %v942_v1 }
  0xec   :  { %777 = vmatpush3.msra.mxu1 %v584_v16 }
  0xed   :  { %778 = vmatprep.subr.mxu1 %v942_v1 }
  0xee   :  { %779 = vmatpush3.msra.mxu1 %v583_v19  ;;  %v806_v29 = vpop.eup %805 }
  0xef   :  { %780 = vmatprep.subr.mxu1 %v942_v1  ;;  %791 = vpush %v806_v29 }
  0xf0   :  { %781 = vmatpush3.msra.mxu1 %v582_v21 }
  0xf1   :  { %782 = vmatprep.subr.mxu1 %v942_v1 }
  0xf2   :  { %783 = vmatpush3.msra.mxu1 %v581_v22 }
  0xf3   :  { %784 = vmatprep.subr.mxu1 %v942_v1 }
  0xf4   :  { %785 = vmatpush3.msra.mxu1 %v580_v23 }
  0xf5   :  { %786 = vmatprep.subr.mxu1 %v942_v1 }
  0xf6   :  { %787 = vmatpush3.msra.mxu1 %v579_v24 }
 0x120   :  { %s792_s10 = spop %791 }
 0x121   :  { %v676_v33 = vstv %s792_s10 }
 0x14a   :  { %v574_v30 = vpop.permute.xlu1 %573 }
 0x19f   :  { %v327_v17 = vpop.f32.mrf.mxu0 }
 0x1a0   :  { %v331_v18 = vmul.f32 0.125, %v327_v17 }
 0x1a1   :  { %v750_v20 = vpop.f32.mrf.mxu0 }
 0x1a2   :  { %564 = vst.msk [vmem:[#allocation2] sm:$0xff] %vm563_vm0, %v331_v18 }
 0x1aa   :  { %v558_v26 = vpop.f32.mrf.mxu0 }
 0x1ab   :  { %v562_v27 = vmul.f32 0.125, %v558_v26 }
 0x1ac   :  { %v755_v28 = vpop.f32.mrf.mxu0 }
 0x1ad   :  { %566 = vrot.lane.b32.xlu0 %v562_v27, %s945_s9 }
 0x21f   :  { %v567_v31 = vpop.permute.xlu0 %566 }
 0x220   :  { %570 = vst.msk [vmem:[#allocation2] sm:$0xff] %vm569_vm1, %v567_v31 }
 0x221   :  { %577 = vst.msk [vmem:[#allocation2] sm:$0xff] %vm576_vm8, %v574_v30 }
 0x228   :  { %v578_v1 = vld [vmem:[#allocation2] sm:$0xff] }
 0x229   :  { %789 = vmatmul.mubr.f32.vlgmr.msra.gmra.mxu1 %v578_v1 }
 0x2e9   :  { %v668_v34 = vpop.f32.mrf.mxu1 }
 0x2ea   :  { %v669_v35 = vadd.f32 %v715_v32, %v668_v34 }
 0x2eb   :  { %v790_v36 = vpop.f32.mrf.mxu1 }
 0x2ec   :  { %v677_v37 = vmul.f32 %v676_v33, %v669_v35 }
 0x2ee   :  { %678 = vst [vmem:[#allocation13] sm:$0xff] %v677_v37 }
 0x2ef   :  { %918 = shalt.err (!%p915_p1)
}
 0x2f0   :  { %688 = dma.vmem_to_hbm [thread:$0]  %s686_s13, 128, %s1126_s8, [#allocation6]  }
 0x2f1   :  { %933 = dma.done.wait [#allocation6], 128  }
 0x2f2   :  { %934 = vsyncadd [#allocation6], 4294967168 }
 0x2f3   :  { %692 = vsyncpa [#allocation5], 1 }
 0x2f4   :  { %693 = vsyncpa [#allocation8], 1 }
 0x2f5   :  { %694 = vsyncpa [#allocation11], 1 }
 0x2f6   :  { %695 = vsyncpa [#allocation6], 1 }

</bundles_post_ra>
